<compile_context>
chip_gen: v6e
topology: v6e:2x2x1
jax: 0.10.0
libtpu: 0.0.40
codegen_flags: <defaults>
</compile_context>

<pallas_src>
import jax
import jax.numpy as jnp
from jax.experimental import pallas as pl
from jax.experimental.pallas import tpu as pltpu

_LANE = 128
_SUBLANE = 8


def _round_up(n, m):
    return ((n + m - 1) // m) * m


def _cdiv(a, b):
    return (a + b - 1) // b


def _pad2d(a, rows, cols):
    return jnp.pad(a, ((0, rows - a.shape[0]), (0, cols - a.shape[1])))


def decoder_kernel(x_ref, w1_ref, b1_ref, w2_ref, b2_ref, o_ref):
    # First linear + ReLU.  MXU matmul with f32 accumulate; bias add / ReLU on
    # the f32 accumulator (native VPU width on all generations).
    h = jnp.dot(x_ref[...], w1_ref[...], preferred_element_type=jnp.float32)
    h = jnp.maximum(h + b1_ref[...], 0.0)            # b1 is (1, HID_P) -> broadcasts

    # Second linear + sigmoid.  Keep math in f32; downcast only at the store.
    y = jnp.dot(h.astype(w2_ref.dtype), w2_ref[...],
                preferred_element_type=jnp.float32)
    y = y + b2_ref[...]                               # b2 is (1, OUT)
    # sigmoid(y) = 1 / (1 + exp(-y)): exp and reciprocal both ride the EUP slot.
    o_ref[...] = pl.reciprocal(1.0 + jnp.exp(-y)).astype(o_ref.dtype)


def decoder_forward(x, w1, b1, w2, b2, *, tile_m=None):
    """x: (B, latent_dim + n_classes); w1: (in, hidden); w2: (hidden, out).

    Weights are stored transposed relative to PyTorch ((in, out)), so the
    kernel computes plain x @ W.
    """
    B, in_dim = x.shape
    in_dim_w, hid = w1.shape
    hid_w, out_dim = w2.shape
    assert in_dim == in_dim_w and hid == hid_w

    # Only the (tiny) hidden dimension is padded to a full lane width so the
    # intermediate activation is lane-dense; zero padding is exact here.
    hid_p = _round_up(hid, _LANE)

    # Batch tiling: no padding, partial final block handled by Pallas.
    # Cap tile_m so there are >= 2 tiles (v7x megacore); large batches get big
    # tiles (up to 2048 rows) to amortize the ~0.35 us per-step overhead.
    if tile_m is None:
        tile_m = min(2048, max(_SUBLANE, _round_up(_cdiv(B, 2), _SUBLANE)))
    else:
        tile_m = max(_SUBLANE, _round_up(tile_m, _SUBLANE))
    n_tiles = _cdiv(B, tile_m)

    w1_p = _pad2d(w1, in_dim, hid_p)
    w2_p = _pad2d(w2, hid_p, out_dim)
    b1_p = _pad2d(b1.reshape(1, -1), 1, hid_p)
    b2_p = b2.reshape(1, -1)

    itemsize = jnp.dtype(x.dtype).itemsize
    cost = pl.CostEstimate(
        flops=2 * B * (in_dim * hid + hid * out_dim),
        transcendentals=B * out_dim,                  # sigmoid exp
        bytes_accessed=(x.size + w1_p.size + b1_p.size + w2_p.size
                        + b2_p.size + B * out_dim) * itemsize,
    )

    return pl.pallas_call(
        decoder_kernel,
        out_shape=jax.ShapeDtypeStruct((B, out_dim), x.dtype),
        grid=(n_tiles,),
        in_specs=[
            # Last block dim == full array dim (18), so no lane padding needed.
            pl.BlockSpec((tile_m, in_dim), lambda i: (i, 0)),   # x tile per step
            pl.BlockSpec((in_dim, hid_p), lambda i: (0, 0)),    # W1: VMEM-resident
            pl.BlockSpec((1, hid_p), lambda i: (0, 0)),         # b1: VMEM-resident
            pl.BlockSpec((hid_p, out_dim), lambda i: (0, 0)),   # W2: VMEM-resident
            pl.BlockSpec((1, out_dim), lambda i: (0, 0)),       # b2: VMEM-resident
        ],
        # 64-wide output == full last dim: direct store, no post-kernel slice.
        out_specs=pl.BlockSpec((tile_m, out_dim), lambda i: (i, 0)),
        compiler_params=pltpu.CompilerParams(
            dimension_semantics=("parallel",),        # megacore on v7x, free elsewhere
            vmem_limit_bytes=32 * 1024 * 1024,        # tiles are ~1-2 MiB; safe on all gens
        ),
        cost_estimate=cost,
    )(x, w1_p, b1_p, w2_p, b2_p)


def init_decoder_params(key, latent_dim, hidden_dim, output_dim, n_classes,
                        dtype=jnp.float32):
    """Deterministic init mimicking nn.Linear's U(-1/sqrt(fan_in), 1/sqrt(fan_in)).

    Weights are stored transposed relative to PyTorch: (in_features, out_features).
    """
    in1 = latent_dim + n_classes
    k1, k2, k3, k4 = jax.random.split(key, 4)
    lim1 = 1.0 / jnp.sqrt(in1)
    lim2 = 1.0 / jnp.sqrt(hidden_dim)
    w1 = jax.random.uniform(k1, (in1, hidden_dim), dtype, -lim1, lim1)
    b1 = jax.random.uniform(k2, (hidden_dim,), dtype, -lim1, lim1)
    w2 = jax.random.uniform(k3, (hidden_dim, output_dim), dtype, -lim2, lim2)
    b2 = jax.random.uniform(k4, (output_dim,), dtype, -lim2, lim2)
    return w1, b1, w2, b2


def reference_forward(x, w1, b1, w2, b2):
    h = jnp.maximum(x @ w1 + b1, 0.0)
    return jax.nn.sigmoid(h @ w2 + b2)


if __name__ == "__main__":
    # Shapes consistent with the module's forward: x is (batch, latent_dim + n_classes)
    batch = 2
    latent_dim = 8
    n_classes = 10
    hidden_dim = 32
    output_dim = 64

    key = jax.random.PRNGKey(0)
    kx, kp, kx2 = jax.random.split(key, 3)
    x = jax.random.normal(kx, (batch, latent_dim + n_classes), jnp.float32)
    w1, b1, w2, b2 = init_decoder_params(kp, latent_dim, hidden_dim,
                                         output_dim, n_classes)

    out = decoder_forward(x, w1, b1, w2, b2)
    out = jax.block_until_ready(out)
    ref = reference_forward(x, w1, b1, w2, b2)
    assert out.shape == (batch, output_dim)
    assert jnp.allclose(out, ref, atol=1e-5, rtol=1e-5)

    # Second check: odd batch with a small tile to exercise the batch grid
    # (multiple tiles plus a partial final block clipped by Pallas).
    batch2 = 37
    x2 = jax.random.normal(kx2, (batch2, latent_dim + n_classes), jnp.float32)
    out2 = jax.block_until_ready(decoder_forward(x2, w1, b1, w2, b2, tile_m=8))
    ref2 = reference_forward(x2, w1, b1, w2, b2)
    assert out2.shape == (batch2, output_dim)
    assert jnp.allclose(out2, ref2, atol=1e-5, rtol=1e-5)

    print("KERNEL_OK")
</pallas_src>

<mosaic_0001>
module attributes {stable_mosaic.version = 11 : i64} {
  func.func @decoder_kernel(%arg0: i32, %arg1: memref<8x18xf32, #tpu.memory_space<vmem>>, %arg2: memref<18x128xf32, #tpu.memory_space<vmem>>, %arg3: memref<1x128xf32, #tpu.memory_space<vmem>>, %arg4: memref<128x64xf32, #tpu.memory_space<vmem>>, %arg5: memref<1x64xf32, #tpu.memory_space<vmem>>, %arg6: memref<8x64xf32, #tpu.memory_space<vmem>>) attributes {dimension_semantics = [#tpu.dimension_semantics<parallel>], iteration_bounds = array<i64: 1>, scalar_prefetch = 0 : i64, scratch_operands = 0 : i64, tpu.core_type = #tpu.core_type<tc>, window_params = [{transform_indices = @transform_0, window_bounds = array<i64: 8, 18>}, {pipeline_mode = #tpu.pipeline_mode<synchronous>, transform_indices = @transform_1, window_bounds = array<i64: 18, 128>}, {pipeline_mode = #tpu.pipeline_mode<synchronous>, transform_indices = @transform_2, window_bounds = array<i64: 1, 128>}, {pipeline_mode = #tpu.pipeline_mode<synchronous>, transform_indices = @transform_3, window_bounds = array<i64: 128, 64>}, {pipeline_mode = #tpu.pipeline_mode<synchronous>, transform_indices = @transform_4, window_bounds = array<i64: 1, 64>}, {transform_indices = @transform_5, window_bounds = array<i64: 8, 64>}]} {
    %c0 = arith.constant 0 : index
    %c0_0 = arith.constant 0 : index
    %0 = vector.load %arg1[%c0, %c0_0] : memref<8x18xf32, #tpu.memory_space<vmem>>, vector<8x18xf32>
    %c0_1 = arith.constant 0 : index
    %c0_2 = arith.constant 0 : index
    %1 = vector.load %arg2[%c0_1, %c0_2] : memref<18x128xf32, #tpu.memory_space<vmem>>, vector<18x128xf32>
    %cst = arith.constant dense<0.000000e+00> : vector<8x128xf32>
    %2 = tpu.matmul %0, %1, %cst {dimension_numbers = #tpu.dot_dimension_numbers<[1], [0], [0], [1], [0, 0, 1, 1], [], []>} : vector<8x18xf32>, vector<18x128xf32>, vector<8x128xf32> -> vector<8x128xf32>
    %c0_3 = arith.constant 0 : index
    %c0_4 = arith.constant 0 : index
    %3 = vector.load %arg3[%c0_3, %c0_4] : memref<1x128xf32, #tpu.memory_space<vmem>>, vector<1x128xf32>
    %4 = vector.broadcast %3 : vector<1x128xf32> to vector<8x128xf32>
    %5 = arith.addf %2, %4 : vector<8x128xf32>
    %cst_5 = arith.constant 0.000000e+00 : f32
    %6 = vector.broadcast %cst_5 : f32 to vector<8x128xf32>
    %7 = arith.maximumf %5, %6 : vector<8x128xf32>
    %c0_6 = arith.constant 0 : index
    %c0_7 = arith.constant 0 : index
    %8 = vector.load %arg4[%c0_6, %c0_7] : memref<128x64xf32, #tpu.memory_space<vmem>>, vector<128x64xf32>
    %cst_8 = arith.constant dense<0.000000e+00> : vector<8x64xf32>
    %9 = tpu.matmul %7, %8, %cst_8 {dimension_numbers = #tpu.dot_dimension_numbers<[1], [0], [0], [1], [0, 0, 1, 1], [], []>} : vector<8x128xf32>, vector<128x64xf32>, vector<8x64xf32> -> vector<8x64xf32>
    %c0_9 = arith.constant 0 : index
    %c0_10 = arith.constant 0 : index
    %10 = vector.load %arg5[%c0_9, %c0_10] : memref<1x64xf32, #tpu.memory_space<vmem>>, vector<1x64xf32>
    %11 = vector.broadcast %10 : vector<1x64xf32> to vector<8x64xf32>
    %12 = arith.addf %9, %11 : vector<8x64xf32>
    %cst_11 = arith.constant 0.000000e+00 : f32
    %13 = vector.broadcast %cst_11 : f32 to vector<8x64xf32>
    %14 = arith.subf %13, %12 : vector<8x64xf32>
    %15 = math.exp %14 : vector<8x64xf32>
    %cst_12 = arith.constant 1.000000e+00 : f32
    %16 = vector.broadcast %cst_12 : f32 to vector<8x64xf32>
    %17 = arith.addf %16, %15 : vector<8x64xf32>
    %18 = tpu.reciprocal %17 : vector<8x64xf32> -> vector<8x64xf32>
    %c0_13 = arith.constant 0 : index
    %c0_14 = arith.constant 0 : index
    %19 = vector.load %arg6[%c0_13, %c0_14] : memref<8x64xf32, #tpu.memory_space<vmem>>, vector<8x64xf32>
    tpu.vector_store %arg6[%c0_13, %c0_14], %18 {strides = array<i32>} : memref<8x64xf32, #tpu.memory_space<vmem>>, vector<8x64xf32>,
    return
  }
  func.func @transform_0(%arg0: i32) -> (i32, i32) {
    %c0_i32 = arith.constant 0 : i32
    %c0_i32_0 = arith.constant 0 : i32
    return %arg0, %c0_i32 : i32, i32
  }
  func.func @transform_1(%arg0: i32) -> (i32, i32) {
    %c0_i32 = arith.constant 0 : i32
    %c0_i32_0 = arith.constant 0 : i32
    %c0_i32_1 = arith.constant 0 : i32
    return %c0_i32, %c0_i32_0 : i32, i32
  }
  func.func @transform_2(%arg0: i32) -> (i32, i32) {
    %c0_i32 = arith.constant 0 : i32
    %c0_i32_0 = arith.constant 0 : i32
    %c0_i32_1 = arith.constant 0 : i32
    return %c0_i32, %c0_i32_0 : i32, i32
  }
  func.func @transform_3(%arg0: i32) -> (i32, i32) {
    %c0_i32 = arith.constant 0 : i32
    %c0_i32_0 = arith.constant 0 : i32
    %c0_i32_1 = arith.constant 0 : i32
    return %c0_i32, %c0_i32_0 : i32, i32
  }
  func.func @transform_4(%arg0: i32) -> (i32, i32) {
    %c0_i32 = arith.constant 0 : i32
    %c0_i32_0 = arith.constant 0 : i32
    %c0_i32_1 = arith.constant 0 : i32
    return %c0_i32, %c0_i32_0 : i32, i32
  }
  func.func @transform_5(%arg0: i32) -> (i32, i32) {
    %c0_i32 = arith.constant 0 : i32
    %c0_i32_0 = arith.constant 0 : i32
    return %arg0, %c0_i32 : i32, i32
  }
}

</mosaic_0001>

<bundles_post_ra>
// kernel: tpu_custom_call.1
= control target key start
LH: loop header
LB: loop body
LE: loop exit
PB: predicated region body
PF: predicated region fallthrough
CT: control target
= control target key end

     0   :  { %10 = vsyncpa [#allocation3], 0  ;;  %vm36_vm0 = vcmask 1041408   ;;  %v327_v1 = vmov 0.0   ;;  %vm328_vm1 = vmmov 0   ;;  %vm32_vm2 = vcmask 146432   ;;  %s433_s0 = inlined_call_operand.vmem [shape: f32[2,18], index: 0, kind: input, shape index: {}]   ;;  %s434_s1 = inlined_call_operand.vmem [shape: f32[18,128], index: 1, kind: input, shape index: {}]   ;;  %s435_s2 = inlined_call_operand.vmem [shape: f32[1,128], index: 2, kind: input, shape index: {}]   ;;  %s436_s3 = inlined_call_operand.vmem [shape: f32[128,64], index: 3, kind: input, shape index: {}]   ;;  %s437_s4 = inlined_call_operand.vmem [shape: f32[1,64], index: 4, kind: input, shape index: {}]   ;;  %s438_s5 = inlined_call_operand.hbm [shape: f32[2,64], index: 5, kind: output, shape index: {}]  }
   0x1   :  { %v24_v0 = vld [vmem:[%s434_s1 + $0x10] sm:$0x3]  ;;  %252 = vmatprep.subr.mxu0 %v327_v1  ;;  %v23_v2 = vld [vmem:[%s434_s1 + $0x8] sm:$0xff]  ;;  %261 = vmatprep.subr.mxu1 %v327_v1  ;;  %v126_v3 = vld [vmem:[%s436_s3 + $0x78] sm:$0xff]  ;;  %vm209_vm3 = vcmask 523264  }
   0x2   :  { %253 = vmatpush3.msk.msra.mxu0 %vm36_vm0, %v24_v0  ;;  %258 = vmatprep.mubr.msk.f32.mxu0 %vm328_vm1, %v327_v1  ;;  %v125_v4 = vld [vmem:[%s436_s3 + $0x70] sm:$0xff]  ;;  %v22_v5 = vld [vmem:[%s434_s1] sm:$0xff]  ;;  %v124_v7 = vld [vmem:[%s436_s3 + $0x68] sm:$0xff] }
   0x3   :  { %254 = vmatprep.subr.mxu0 %v327_v1  ;;  %262 = vmatpush3.msra.mxu1 %v126_v3  ;;  %v21_v6 = vld [vmem:[%s433_s0] sm:$0xff]  ;;  %v122_v9 = vld [vmem:[%s436_s3 + $0x58] sm:$0xff]  ;;  %v121_v10 = vld [vmem:[%s436_s3 + $0x50] sm:$0xff] }
   0x4   :  { %255 = vmatpush3.msra.mxu0 %v23_v2  ;;  %263 = vmatprep.subr.mxu1 %v327_v1  ;;  %v123_v8 = vld [vmem:[%s436_s3 + $0x60] sm:$0xff]  ;;  %v120_v11 = vld [vmem:[%s436_s3 + $0x48] sm:$0xff]  ;;  %v118_v13 = vld [vmem:[%s436_s3 + $0x38] sm:$0xff] }
   0x5   :  { %256 = vmatprep.subr.mxu0 %v327_v1  ;;  %264 = vmatpush3.msra.mxu1 %v125_v4  ;;  %v119_v12 = vld [vmem:[%s436_s3 + $0x40] sm:$0xff]  ;;  %v117_v14 = vld [vmem:[%s436_s3 + $0x30] sm:$0xff]  ;;  %v116_v15 = vld [vmem:[%s436_s3 + $0x28] sm:$0xff] }
   0x6   :  { %257 = vmatpush3.msra.mxu0 %v22_v5  ;;  %265 = vmatprep.subr.mxu1 %v327_v1  ;;  %v115_v16 = vld [vmem:[%s436_s3 + $0x20] sm:$0xff]  ;;  %v114_v17 = vld [vmem:[%s436_s3 + $0x18] sm:$0xff]  ;;  %v113_v18 = vld [vmem:[%s436_s3 + $0x10] sm:$0xff] }
   0x7   :  { %259 = vmatmul.mubr.msk.f32.vlgmr.msra.gmra.mxu0 %vm32_vm2, %v21_v6  ;;  %266 = vmatpush3.msra.mxu1 %v124_v7  ;;  %v112_v19 = vld [vmem:[%s436_s3 + $0x8] sm:$0xff]  ;;  %v111_v20 = vld [vmem:[%s436_s3] sm:$0xff] }
   0x8   :  { %267 = vmatprep.subr.mxu1 %v327_v1  ;;  %293 = vmatprep.mubr.msk.f32.mxu1 %vm328_vm1, %v327_v1  ;;  %v227_v21 = vld [vmem:[%s435_s2] ss:$0 sm:$0xff] }
   0x9   :  { %268 = vmatpush3.msra.mxu1 %v123_v8  ;;  %v230_v26 = vld [vmem:[%s437_s4] ss:$0 sm:$0xff] }
   0xa   :  { %269 = vmatprep.subr.mxu1 %v327_v1 }
   0xb   :  { %270 = vmatpush3.msra.mxu1 %v122_v9 }
   0xc   :  { %271 = vmatprep.subr.mxu1 %v327_v1 }
   0xd   :  { %272 = vmatpush3.msra.mxu1 %v121_v10 }
   0xe   :  { %273 = vmatprep.subr.mxu1 %v327_v1 }
   0xf   :  { %274 = vmatpush3.msra.mxu1 %v120_v11 }
  0x10   :  { %275 = vmatprep.subr.mxu1 %v327_v1 }
  0x11   :  { %276 = vmatpush3.msra.mxu1 %v119_v12 }
  0x12   :  { %277 = vmatprep.subr.mxu1 %v327_v1 }
  0x13   :  { %278 = vmatpush3.msra.mxu1 %v118_v13 }
  0x14   :  { %279 = vmatprep.subr.mxu1 %v327_v1 }
  0x15   :  { %280 = vmatpush3.msra.mxu1 %v117_v14 }
  0x16   :  { %281 = vmatprep.subr.mxu1 %v327_v1 }
  0x17   :  { %282 = vmatpush3.msra.mxu1 %v116_v15 }
  0x18   :  { %283 = vmatprep.subr.mxu1 %v327_v1 }
  0x19   :  { %284 = vmatpush3.msra.mxu1 %v115_v16 }
  0x1a   :  { %285 = vmatprep.subr.mxu1 %v327_v1 }
  0x1b   :  { %286 = vmatpush3.msra.mxu1 %v114_v17 }
  0x1c   :  { %287 = vmatprep.subr.mxu1 %v327_v1 }
  0x1d   :  { %288 = vmatpush3.msra.mxu1 %v113_v18 }
  0x1e   :  { %289 = vmatprep.subr.mxu1 %v327_v1 }
  0x1f   :  { %290 = vmatpush3.msra.mxu1 %v112_v19 }
  0x20   :  { %291 = vmatprep.subr.mxu1 %v327_v1 }
  0x21   :  { %292 = vmatpush3.msra.mxu1 %v111_v20 }
  0xc7   :  { %v106_v22 = vpop.f32.mrf.mxu0 }
  0xc8   :  { %v107_v23 = vadd.f32 %v227_v21, %v106_v22 }
  0xc9   :  { %v260_v24 = vpop.f32.mrf.mxu0 }
  0xca   :  { %v110_v25 = vmax.f32 %v107_v23, 0.0 }
  0xcc   :  { %294 = vmatmul.mubr.f32.vlgmr.msra.gmra.mxu1 %v110_v25 }
 0x18c   :  { %v200_v27 = vpop.f32.mrf.mxu1 }
 0x18d   :  { %v201_v28 = vadd.f32 %v230_v26, %v200_v27 }
 0x18e   :  { %v295_v29 = vpop.f32.mrf.mxu1 }
 0x18f   :  { %v204_v30 = vsub.f32 0.0, %v201_v28 }
 0x191   :  { %v205_v31 = vmul.f32 1.442695, %v204_v30 }
 0x193   :  { %301 = vpow2.f32 %v205_v31 }
 0x1a0   :  { %v302_v32 = vpop.eup %301 }
 0x1a1   :  { %v207_v33 = vadd.f32 1.0, %v302_v32 }
 0x1a3   :  { %303 = vrcp.f32 %v207_v33 }
 0x1b0   :  { %v304_v34 = vpop.eup %303 }
 0x1b1   :  { %210 = vst.msk [vmem:[#allocation2] sm:$0xff] %vm209_vm3, %v304_v34 }
 0x1b2   :  { %215 = vsyncadd [#allocation3], 96  ;;  %s329_s2 = smov [#allocation2]  }
 0x1b3   :  { %s216_s3 = sshll.u32 %s329_s2, 4  ;;  %s217_s3 = int_to_ptr.vmem [resolvable:$true] %s216_s3 }
 0x1b4   :  { %s305_s9 = scalar_lea.vmem %s217_s3, 32  ;;  %s309_s0 = scalar_lea.vmem %s217_s3, 128 }
 0x1b5   :  { %p306_p0 = scmp.ne.s32.totalorder %s217_s3, %s305_s9  ;;  %p310_p1 = scmp.lt.s32.totalorder %s217_s3, %s217_s3 }
 0x1b6   :  { %p311_p2 = scmp.lt.s32.totalorder %s309_s0, %s305_s9 }
 0x1b8   :  { %p312_p3 = por %p311_p2, %p310_p1 }
 0x1ba   :  { %p313_p4 = pnand %p312_p3, %p306_p0 }
 0x1bc   :  { %316 = shalt.err (!%p313_p4)
}
 0x1bd   :  { %s330_s4 = smov 32   ;;  %s331_s10 = smov 2  }
 0x1be   :  { %222 = dma.vmem_to_hbm [thread:$0]  %s217_s3, 32, %s438_s5, [#allocation3], %s330_s4, %s330_s4, %s331_s10  }
 0x1bf   :  { %325 = dma.done.wait [#allocation3], 128  }
 0x1c0   :  { %326 = vsyncadd [#allocation3], 4294967168 }
 0x1c1   :  { %226 = vsyncpa [#allocation3], 1 }

</bundles_post_ra>
